<compile_context>
chip_gen: v6e
topology: v6e:2x2x1
jax: 0.10.0
libtpu: 0.0.40
codegen_flags: <defaults>
</compile_context>

<pallas_src>
import functools

import jax
import jax.numpy as jnp
from jax.experimental import pallas as pl
from jax.experimental.pallas import tpu as pltpu

LANE = 128            # TPU vreg lane width
ROW_ALIGN = 16        # sublane alignment (16 covers bf16 packing)
MAX_ROW_TILE = 2048   # batch tile upper bound (tiny vs VMEM even on v7x's 64 MiB)
NEG_MASK = -1e30      # finite mask baked into b2p pad lanes (exp underflows to 0)


def _round_up(n, m):
    return ((n + m - 1) // m) * m


def policy_net_kernel(x_ref, w1_ref, b1_ref, w2_ref, b2_ref, out_ref):
    # x: (TB, F) bf16; w1: (F, 128) bf16; w2: (128, O_pad) bf16; biases f32.
    x = x_ref[...]
    h = jnp.dot(x, w1_ref[...], preferred_element_type=jnp.float32)     # MXU
    h = jnp.maximum(h + b1_ref[...], 0.0)                               # VPU relu
    logits = jnp.dot(h.astype(w2_ref.dtype), w2_ref[...],
                     preferred_element_type=jnp.float32)                # MXU
    # Pad lanes of b2 carry -1e30, so padded logits underflow to 0 after exp.
    logits = logits + b2_ref[...]                                       # (TB, O_pad)

    m = jnp.max(logits, axis=-1, keepdims=True)
    e = jnp.exp(logits - m)                                             # EUP
    denom = jnp.sum(e, axis=-1, keepdims=True)
    out_ref[...] = (e * pl.reciprocal(denom, approx=True)).astype(out_ref.dtype)


def prepare_params(w1, b1, w2, b2):
    """One-time host-side padding to lane-dense, MXU-friendly layouts.

    The softmax mask is baked into b2p: padded output lanes get -1e30.
    """
    in_size, hidden = w1.shape
    out_size = w2.shape[1]
    h_pad = _round_up(hidden, LANE)
    o_pad = _round_up(out_size, LANE)
    w1p = jnp.zeros((in_size, h_pad), jnp.bfloat16).at[:, :hidden].set(
        w1.astype(jnp.bfloat16))
    b1p = jnp.zeros((1, h_pad), jnp.float32).at[:, :hidden].set(
        b1.reshape(1, -1).astype(jnp.float32))
    w2p = jnp.zeros((h_pad, o_pad), jnp.bfloat16).at[:hidden, :out_size].set(
        w2.astype(jnp.bfloat16))
    b2p = jnp.full((1, o_pad), NEG_MASK, jnp.float32).at[:, :out_size].set(
        b2.reshape(1, -1).astype(jnp.float32))
    return w1p, b1p, w2p, b2p


def _pick_batch_tile(batch):
    """Sublane-aligned batch tile; even grid when there is enough work so
    v7x's 2 TensorCores both get shards (neutral on v5e/v6e)."""
    b_align = _round_up(batch, ROW_ALIGN)
    if b_align > ROW_ALIGN:
        n_steps = max(2, 2 * pl.cdiv(b_align, 2 * MAX_ROW_TILE))
        tb = _round_up(pl.cdiv(b_align, n_steps), ROW_ALIGN)
        tb = min(tb, MAX_ROW_TILE)
    else:
        tb = b_align
    b_pad = _round_up(b_align, tb)
    return tb, b_pad


@functools.partial(jax.jit, static_argnames=("input_size", "out_size", "trim"))
def policy_network_forward(x, w1p, b1p, w2p, b2p, *, input_size, out_size,
                           trim=True):
    # Flatten like PyTorch x.view((-1, input_size)).
    x2d = x.reshape((-1, input_size))
    batch = x2d.shape[0]

    tb, b_pad = _pick_batch_tile(batch)
    if b_pad != batch:
        x2d = jnp.pad(x2d, ((0, b_pad - batch), (0, 0)))
    x2d = x2d.astype(jnp.bfloat16)

    h_pad = w1p.shape[1]
    o_pad = w2p.shape[1]

    out_padded = pl.pallas_call(
        policy_net_kernel,
        out_shape=jax.ShapeDtypeStruct((b_pad, o_pad), jnp.bfloat16),
        grid=(b_pad // tb,),
        in_specs=[
            pl.BlockSpec((tb, input_size), lambda i: (i, 0)),      # x tile (pipelined)
            pl.BlockSpec((input_size, h_pad), lambda i: (0, 0)),   # w1 resident
            pl.BlockSpec((1, h_pad), lambda i: (0, 0)),            # b1 resident
            pl.BlockSpec((h_pad, o_pad), lambda i: (0, 0)),        # w2 resident
            pl.BlockSpec((1, o_pad), lambda i: (0, 0)),            # b2 resident (mask baked in)
        ],
        out_specs=pl.BlockSpec((tb, o_pad), lambda i: (i, 0)),
        compiler_params=pltpu.CompilerParams(
            dimension_semantics=("parallel",)),  # megacore sharding on v7x
    )(x2d, w1p, b1p, w2p, b2p)

    if not trim:
        # Caller can consume the lane/batch-padded slab directly and avoid the
        # extra HBM-bound slice op (padded lanes hold exact zeros).
        return out_padded
    return out_padded[:batch, :out_size]


def init_params(key, input_size, hidden, output_size):
    # Deterministic init mimicking nn.Linear's U(-1/sqrt(fan_in), 1/sqrt(fan_in)).
    # Weights are stored pre-transposed vs. PyTorch (in, out) so kernel does x@w+b.
    k1, k2, k3, k4 = jax.random.split(key, 4)
    lim1 = 1.0 / jnp.sqrt(jnp.float32(input_size))
    lim2 = 1.0 / jnp.sqrt(jnp.float32(hidden))
    w1 = jax.random.uniform(k1, (input_size, hidden), jnp.float32, -lim1, lim1)
    b1 = jax.random.uniform(k2, (hidden,), jnp.float32, -lim1, lim1)
    w2 = jax.random.uniform(k3, (hidden, output_size), jnp.float32, -lim2, lim2)
    b2 = jax.random.uniform(k4, (output_size,), jnp.float32, -lim2, lim2)
    return w1, b1, w2, b2


if __name__ == "__main__":
    INPUT_SIZE = 16
    HIDDEN = 32
    OUTPUT_SIZE = 8
    BATCH = 2

    key = jax.random.PRNGKey(0)
    kx, kp = jax.random.split(key)
    # Input shaped (B, 4, 4); forward flattens to (B, 16) like x.view((-1, input_size)).
    x = jax.random.normal(kx, (BATCH, 4, 4), dtype=jnp.float32)
    w1, b1, w2, b2 = init_params(kp, INPUT_SIZE, HIDDEN, OUTPUT_SIZE)
    w1p, b1p, w2p, b2p = prepare_params(w1, b1, w2, b2)

    out = policy_network_forward(
        x, w1p, b1p, w2p, b2p, input_size=INPUT_SIZE, out_size=OUTPUT_SIZE)
    out = jax.block_until_ready(out)
    out_f32 = out.astype(jnp.float32)

    # Reference in plain JAX with the same bf16-operand / f32-accumulate math.
    x2d = x.reshape((-1, INPUT_SIZE))
    xb = x2d.astype(jnp.bfloat16).astype(jnp.float32)
    w1b = w1.astype(jnp.bfloat16).astype(jnp.float32)
    w2b = w2.astype(jnp.bfloat16).astype(jnp.float32)
    h = jnp.maximum(xb @ w1b + b1[None, :], 0.0)
    hb = h.astype(jnp.bfloat16).astype(jnp.float32)
    ref = jax.nn.softmax(hb @ w2b + b2[None, :], axis=1)

    assert out.shape == (BATCH, OUTPUT_SIZE)
    assert out.dtype == jnp.bfloat16
    # bf16 output + approx reciprocal: compare with tolerances matched to bf16.
    assert jnp.allclose(out_f32, ref, atol=2e-3, rtol=2e-2)
    assert jnp.allclose(jnp.sum(out_f32, axis=1), 1.0, atol=5e-3)

    print("KERNEL_OK")
</pallas_src>

<mosaic_0001>
module attributes {stable_mosaic.version = 11 : i64} {
  func.func @policy_net_kernel(%arg0: i32, %arg1: memref<16x16xbf16, #tpu.memory_space<vmem>>, %arg2: memref<16x128xbf16, #tpu.memory_space<vmem>>, %arg3: memref<1x128xf32, #tpu.memory_space<vmem>>, %arg4: memref<128x128xbf16, #tpu.memory_space<vmem>>, %arg5: memref<1x128xf32, #tpu.memory_space<vmem>>, %arg6: memref<16x128xbf16, #tpu.memory_space<vmem>>) attributes {dimension_semantics = [#tpu.dimension_semantics<parallel>], iteration_bounds = array<i64: 1>, scalar_prefetch = 0 : i64, scratch_operands = 0 : i64, tpu.core_type = #tpu.core_type<tc>, window_params = [{transform_indices = @transform_0, window_bounds = array<i64: 16, 16>}, {pipeline_mode = #tpu.pipeline_mode<synchronous>, transform_indices = @transform_1, window_bounds = array<i64: 16, 128>}, {pipeline_mode = #tpu.pipeline_mode<synchronous>, transform_indices = @transform_2, window_bounds = array<i64: 1, 128>}, {pipeline_mode = #tpu.pipeline_mode<synchronous>, transform_indices = @transform_3, window_bounds = array<i64: 128, 128>}, {pipeline_mode = #tpu.pipeline_mode<synchronous>, transform_indices = @transform_4, window_bounds = array<i64: 1, 128>}, {transform_indices = @transform_5, window_bounds = array<i64: 16, 128>}]} {
    %c0 = arith.constant 0 : index
    %c0_0 = arith.constant 0 : index
    %0 = vector.load %arg1[%c0, %c0_0] : memref<16x16xbf16, #tpu.memory_space<vmem>>, vector<16x16xbf16>
    %c0_1 = arith.constant 0 : index
    %c0_2 = arith.constant 0 : index
    %1 = vector.load %arg2[%c0_1, %c0_2] : memref<16x128xbf16, #tpu.memory_space<vmem>>, vector<16x128xbf16>
    %cst = arith.constant dense<0.000000e+00> : vector<16x128xf32>
    %2 = tpu.matmul %0, %1, %cst {dimension_numbers = #tpu.dot_dimension_numbers<[1], [0], [0], [1], [0, 0, 1, 1], [], []>} : vector<16x16xbf16>, vector<16x128xbf16>, vector<16x128xf32> -> vector<16x128xf32>
    %c0_3 = arith.constant 0 : index
    %c0_4 = arith.constant 0 : index
    %3 = vector.load %arg3[%c0_3, %c0_4] : memref<1x128xf32, #tpu.memory_space<vmem>>, vector<1x128xf32>
    %4 = vector.broadcast %3 : vector<1x128xf32> to vector<16x128xf32>
    %5 = arith.addf %2, %4 : vector<16x128xf32>
    %cst_5 = arith.constant 0.000000e+00 : f32
    %6 = vector.broadcast %cst_5 : f32 to vector<16x128xf32>
    %7 = arith.maximumf %5, %6 : vector<16x128xf32>
    %8 = arith.truncf %7 : vector<16x128xf32> to vector<16x128xbf16>
    %c0_6 = arith.constant 0 : index
    %c0_7 = arith.constant 0 : index
    %9 = vector.load %arg4[%c0_6, %c0_7] : memref<128x128xbf16, #tpu.memory_space<vmem>>, vector<128x128xbf16>
    %cst_8 = arith.constant dense<0.000000e+00> : vector<16x128xf32>
    %10 = tpu.matmul %8, %9, %cst_8 {dimension_numbers = #tpu.dot_dimension_numbers<[1], [0], [0], [1], [0, 0, 1, 1], [], []>} : vector<16x128xbf16>, vector<128x128xbf16>, vector<16x128xf32> -> vector<16x128xf32>
    %c0_9 = arith.constant 0 : index
    %c0_10 = arith.constant 0 : index
    %11 = vector.load %arg5[%c0_9, %c0_10] : memref<1x128xf32, #tpu.memory_space<vmem>>, vector<1x128xf32>
    %12 = vector.broadcast %11 : vector<1x128xf32> to vector<16x128xf32>
    %13 = arith.addf %10, %12 : vector<16x128xf32>
    %cst_11 = arith.constant dense<0xFF800000> : vector<16xf32>
    %14 = vector.multi_reduction <maximumf>, %13, %cst_11 [1] : vector<16x128xf32> to vector<16xf32>
    %15 = vector.shape_cast %14 : vector<16xf32> to vector<16x1xf32>
    %16 = vector.broadcast %15 : vector<16x1xf32> to vector<16x128xf32>
    %17 = arith.subf %13, %16 : vector<16x128xf32>
    %18 = math.exp %17 : vector<16x128xf32>
    %cst_12 = arith.constant dense<0.000000e+00> : vector<16xf32>
    %19 = vector.multi_reduction <add>, %18, %cst_12 [1] : vector<16x128xf32> to vector<16xf32>
    %20 = vector.shape_cast %19 : vector<16xf32> to vector<16x1xf32>
    %21 = tpu.reciprocal %20 {approx = true} : vector<16x1xf32> -> vector<16x1xf32>
    %22 = vector.broadcast %21 : vector<16x1xf32> to vector<16x128xf32>
    %23 = arith.mulf %18, %22 : vector<16x128xf32>
    %24 = arith.truncf %23 : vector<16x128xf32> to vector<16x128xbf16>
    %c0_13 = arith.constant 0 : index
    %c0_14 = arith.constant 0 : index
    %25 = vector.load %arg6[%c0_13, %c0_14] : memref<16x128xbf16, #tpu.memory_space<vmem>>, vector<16x128xbf16>
    tpu.vector_store %arg6[%c0_13, %c0_14], %24 {strides = array<i32>} : memref<16x128xbf16, #tpu.memory_space<vmem>>, vector<16x128xbf16>,
    return
  }
  func.func @transform_0(%arg0: i32) -> (i32, i32) {
    %c0_i32 = arith.constant 0 : i32
    %c0_i32_0 = arith.constant 0 : i32
    return %arg0, %c0_i32 : i32, i32
  }
  func.func @transform_1(%arg0: i32) -> (i32, i32) {
    %c0_i32 = arith.constant 0 : i32
    %c0_i32_0 = arith.constant 0 : i32
    %c0_i32_1 = arith.constant 0 : i32
    return %c0_i32, %c0_i32_0 : i32, i32
  }
  func.func @transform_2(%arg0: i32) -> (i32, i32) {
    %c0_i32 = arith.constant 0 : i32
    %c0_i32_0 = arith.constant 0 : i32
    %c0_i32_1 = arith.constant 0 : i32
    return %c0_i32, %c0_i32_0 : i32, i32
  }
  func.func @transform_3(%arg0: i32) -> (i32, i32) {
    %c0_i32 = arith.constant 0 : i32
    %c0_i32_0 = arith.constant 0 : i32
    %c0_i32_1 = arith.constant 0 : i32
    return %c0_i32, %c0_i32_0 : i32, i32
  }
  func.func @transform_4(%arg0: i32) -> (i32, i32) {
    %c0_i32 = arith.constant 0 : i32
    %c0_i32_0 = arith.constant 0 : i32
    %c0_i32_1 = arith.constant 0 : i32
    return %c0_i32, %c0_i32_0 : i32, i32
  }
  func.func @transform_5(%arg0: i32) -> (i32, i32) {
    %c0_i32 = arith.constant 0 : i32
    %c0_i32_0 = arith.constant 0 : i32
    return %arg0, %c0_i32 : i32, i32
  }
}

</mosaic_0001>

<bundles_post_ra>
// kernel: policy_network_forward.1
= control target key start
LH: loop header
LB: loop body
LE: loop exit
PB: predicated region body
PF: predicated region fallthrough
CT: control target
= control target key end

     0   :  { %10 = vsyncpa [#allocation3], 0  ;;  %s354_s18 = smov [#allocation2]   ;;  %s407_s0 = inlined_call_operand.vmem [shape: bf16[16,16], index: 0, kind: input, shape index: {}]   ;;  %s408_s1 = inlined_call_operand.vmem [shape: bf16[16,128], index: 1, kind: input, shape index: {}]   ;;  %s409_s2 = inlined_call_operand.vmem [shape: f32[1,128], index: 2, kind: input, shape index: {}]   ;;  %s410_s3 = inlined_call_operand.hbm [shape: bf16[128,128], index: 3, kind: input, shape index: {}]   ;;  %s411_s4 = inlined_call_operand.vmem [shape: f32[1,128], index: 4, kind: input, shape index: {}]   ;;  %s412_s5 = inlined_call_operand.vmem [shape: bf16[16,128], index: 5, kind: output, shape index: {}]  }
   0x1   :  { %s22_s19 = sshll.u32 %s354_s18, 4  ;;  %s23_s19 = int_to_ptr.vmem [resolvable:$true] %s22_s19 }
   0x2   :  { %s340_s20 = scalar_lea.vmem %s23_s19, 1024  ;;  %p345_p1 = scmp.lt.s32.totalorder %s23_s19, %s23_s19 }
   0x3   :  { %p341_p0 = scmp.ne.s32.totalorder %s23_s19, %s340_s20  ;;  %p346_p2 = scmp.lt.s32.totalorder %s340_s20, %s340_s20 }
   0x5   :  { %p347_p3 = por %p346_p2, %p345_p1 }
   0x7   :  { %p348_p4 = pnand %p347_p3, %p341_p0 }
   0x9   :  { %351 = shalt.err (!%p348_p4)
}
   0xa   :  { %s355_s21 = smov 64   ;;  %s356_s22 = smov 4  }
   0xb   :  { %28 = dma.hbm_to_vmem [thread:$0]  %s410_s3, 1024, %s23_s19, [#allocation3], %s355_s21, %s355_s21, %s356_s22  }
   0xc   :  { %352 = dma.done.wait [#allocation3], 1024  }
   0xd   :  { %353 = vsyncadd [#allocation3], 4294966272  ;;  %v357_v0 = vmov 0.0   ;;  %vm358_vm0 = vmmov 0   ;;  %v314_v1 = vld [vmem:[%s408_s1] sm:$0xff]   ;;  %vm57_vm1 = vcmask 130048  }
   0xe   :  { %283 = vmatprep.subr.bf16.mxu0 %v357_v0  ;;  %285 = vmatprep.mubr.msk.bf16.mxu0 %vm358_vm0, %v357_v0  ;;  %v315_v2 = vld [vmem:[%s407_s0] sm:$0xff]   ;;  %v316_v3 = vld [vmem:[#allocation2 + $0x38] sm:$0xff]   ;;  %v317_v4 = vld [vmem:[#allocation2 + $0x30] sm:$0xff]  }
   0xf   :  { %289 = vmatprep.subr.bf16.mxu1 %v357_v0  ;;  %305 = vmatprep.mubr.msk.bf16.mxu1 %vm358_vm0, %v357_v0  ;;  %v318_v5 = vld [vmem:[#allocation2 + $0x28] sm:$0xff]   ;;  %v319_v6 = vld [vmem:[#allocation2 + $0x20] sm:$0xff]   ;;  %v320_v7 = vld [vmem:[#allocation2 + $0x18] sm:$0xff]  }
  0x10   :  { %284 = vmatpush3.bf16.msra.mxu0 %v314_v1  ;;  %290 = vmatpush3.bf16.msra.mxu1 %v316_v3  ;;  %v321_v8 = vld [vmem:[#allocation2 + $0x10] sm:$0xff]   ;;  %v322_v9 = vld [vmem:[#allocation2 + $0x8] sm:$0xff]   ;;  %v323_v10 = vld [vmem:[#allocation2] sm:$0xff]  }
  0x11   :  { %291 = vmatprep.subr.bf16.mxu1 %v357_v0  ;;  %v250_v11 = vld [vmem:[%s409_s2] ss:$0 sm:$0xff] }
  0x12   :  { %v254_v21 = vld [vmem:[%s411_s4] ss:$0 sm:$0xff] }
  0x13   :  { %286 = vmatmul.mubr.msk.bf16.vlgmr.msra.gmra.mxu0 %vm57_vm1, %v315_v2 }
  0x14   :  { %292 = vmatpush3.bf16.msra.mxu1 %v317_v4 }
  0x15   :  { %293 = vmatprep.subr.bf16.mxu1 %v357_v0 }
  0x18   :  { %294 = vmatpush3.bf16.msra.mxu1 %v318_v5 }
  0x19   :  { %295 = vmatprep.subr.bf16.mxu1 %v357_v0 }
  0x1c   :  { %296 = vmatpush3.bf16.msra.mxu1 %v319_v6 }
  0x1d   :  { %297 = vmatprep.subr.bf16.mxu1 %v357_v0 }
  0x20   :  { %298 = vmatpush3.bf16.msra.mxu1 %v320_v7 }
  0x21   :  { %299 = vmatprep.subr.bf16.mxu1 %v357_v0 }
  0x24   :  { %300 = vmatpush3.bf16.msra.mxu1 %v321_v8 }
  0x25   :  { %301 = vmatprep.subr.bf16.mxu1 %v357_v0 }
  0x28   :  { %302 = vmatpush3.bf16.msra.mxu1 %v322_v9 }
  0x29   :  { %303 = vmatprep.subr.bf16.mxu1 %v357_v0 }
  0x2c   :  { %304 = vmatpush3.bf16.msra.mxu1 %v323_v10 }
  0xd3   :  { %v95_v12 = vpop.f32.mrf.mxu0 }
  0xd4   :  { %v96_v14 = vadd.f32 %v250_v11, %v95_v12 }
  0xd5   :  { %v287_v13 = vpop.f32.mrf.mxu0 }
  0xd6   :  { %v102_v18 = vmax.f32 %v96_v14, 0.0 }
  0xd7   :  { %v98_v15 = vpop.f32.mrf.mxu0 }
  0xd8   :  { %v99_v16 = vadd.f32 %v250_v11, %v98_v15 }
  0xd9   :  { %v288_v17 = vpop.f32.mrf.mxu0 }
  0xda   :  { %v103_v19 = vmax.f32 %v99_v16, 0.0 }
  0xdc   :  { %v104_v20 = vpack.c.bf16 %v103_v19, %v102_v18 }
  0xde   :  { %306 = vmatmul.mubr.bf16.vlgmr.msra.gmra.mxu1 %v104_v20 }
 0x19e   :  { %v210_v22 = vpop.f32.mrf.mxu1 }
 0x19f   :  { %v211_v23 = vadd.f32 %v254_v21, %v210_v22 }
 0x1a0   :  { %v307_v24 = vpop.f32.mrf.mxu1 }
 0x1a1   :  { %217 = vmax.xlane.f32.xlu0 %v211_v23 }
 0x1a2   :  { %v213_v25 = vpop.f32.mrf.mxu1 }
 0x1a3   :  { %v214_v26 = vadd.f32 %v254_v21, %v213_v25 }
 0x1a4   :  { %v308_v27 = vpop.f32.mrf.mxu1 }
 0x1a5   :  { %219 = vmax.xlane.f32.xlu0 %v214_v26 }
 0x22a   :  { %v218_v28 = vpop.xlane.xlu0 %217 }
 0x22b   :  { %v221_v29 = vsub.f32 %v211_v23, %v218_v28 }
 0x22d   :  { %v223_v30 = vmul.f32 1.442695, %v221_v29 }
 0x22e   :  { %v220_v31 = vpop.xlane.xlu0 %219 }
 0x22f   :  { %324 = vpow2.f32 %v223_v30  ;;  %v222_v32 = vsub.f32 %v214_v26, %v220_v31 }
 0x231   :  { %v225_v33 = vmul.f32 1.442695, %v222_v32 }
 0x233   :  { %326 = vpow2.f32 %v225_v33 }
 0x23c   :  { %v325_v34 = vpop.eup %324 }
 0x23d   :  { %227 = vadd.xlane.f32.xlu1 %v325_v34 }
 0x240   :  { %v327_v35 = vpop.eup %326 }
 0x241   :  { %229 = vadd.xlane.f32.xlu1 %v327_v35 }
 0x2c6   :  { %v228_v36 = vpop.xlane.xlu1 %227 }
 0x2c7   :  { %328 = vrcp.f32 %v228_v36 }
 0x2ca   :  { %v230_v37 = vpop.xlane.xlu1 %229 }
 0x2cb   :  { %330 = vrcp.f32 %v230_v37 }
 0x2d4   :  { %v329_v38 = vpop.eup %328 }
 0x2d5   :  { %v233_v40 = vmul.f32 %v329_v38, %v325_v34 }
 0x2d8   :  { %v331_v39 = vpop.eup %330 }
 0x2d9   :  { %v234_v41 = vmul.f32 %v331_v39, %v327_v35 }
 0x2db   :  { %v270_v42 = vpack.c.bf16 %v234_v41, %v233_v40 }
 0x2dd   :  { %271 = vst [vmem:[%s412_s5] sm:$0xff] %v270_v42  }
 0x2de   :  { %249 = vsyncpa [#allocation3], 1 }

</bundles_post_ra>
